<compile_context>
chip_gen: v5e
topology: v5e:2x2
jax: 0.10.0
libtpu: 0.0.40
codegen_flags: <defaults>
</compile_context>

<pallas_src>
import jax
import jax.numpy as jnp
from jax import lax
from jax.experimental import pallas as pl
from jax.experimental.pallas import tpu as pltpu

EPS = 1e-5
LANES = 128


# ---------------------------------------------------------------------------
# Kernel.
#   x_ref    : (tb, F)     input rows (any float dtype, cast to bf16 here)
#   w1_ref   : (F, 128)    bf16, norm0 folded in, out-dim zero-padded to 128
#   w2_ref   : (128, 128)  bf16, norm1 folded in, zero-padded
#   w3_ref   : (8, 128)    bf16, row r = folded fc3 column r; lane `h2` = b3[r]
#   bias_ref : (8, 128)    f32,  row0 = b1, row1 = b2 (+1.0 at lane `h2`)
#   o_ref    : (8, tb)     f32,  row r = sigmoid(logit_r) for every batch row
# ---------------------------------------------------------------------------
def kidney_kernel(x_ref, w1_ref, w2_ref, w3_ref, bias_ref, o_ref):
    x = x_ref[...].astype(jnp.bfloat16)

    b1 = bias_ref[0:1, :]
    b2 = bias_ref[1:2, :]

    h = jnp.dot(x, w1_ref[...], preferred_element_type=jnp.float32) + b1
    h = jnp.maximum(h, 0.0).astype(jnp.bfloat16)

    h = jnp.dot(h, w2_ref[...], preferred_element_type=jnp.float32) + b2
    h = jnp.maximum(h, 0.0).astype(jnp.bfloat16)   # lane `h2` == 1.0 (bias carrier)

    # Lane-packed last layer: logits[r, j] = sum_k w3[r, k] * h[j, k]
    # (contract feature dim of both operands -> batch lands on output lanes).
    logits = lax.dot_general(
        w3_ref[...], h, (((1,), (1,)), ((), ())),
        preferred_element_type=jnp.float32)          # (8, tb)

    o_ref[...] = jax.nn.sigmoid(logits).astype(o_ref.dtype)


# ---------------------------------------------------------------------------
# One-time parameter preparation: fold norms into Linear weights, pad to 128
# lanes, pack biases + fc3 into lane-dense slabs, cast MXU operands to bf16.
# ---------------------------------------------------------------------------
def prepare_params(p):
    def fold(gamma, beta, m, v, w, b):
        # norm(h) = (h - m)/sqrt(v+eps)*gamma + beta = h*scale + shift
        inv_std = 1.0 / jnp.sqrt(v + EPS)
        scale = gamma * inv_std                       # (1, in)
        shift = beta - m * scale                      # (1, in)
        # (h*scale + shift) @ W + b == h @ (scale.T * W) + (shift @ W + b)
        w_f = (w * scale.reshape(-1, 1)).astype(jnp.float32)
        b_f = (shift @ w + b).astype(jnp.float32)
        return w_f, b_f

    w1, b1 = fold(p["g0"], p["be0"], p["m0"], p["v0"], p["w1"], p["b1"])
    w2, b2 = fold(p["g1"], p["be1"], p["m1"], p["v1"], p["w2"], p["b2"])
    w3, b3 = fold(p["g2"], p["be2"], p["m2"], p["v2"], p["w3"], p["b3"])

    in_f, h1 = w1.shape
    h2 = w2.shape[1]
    out_f = w3.shape[1]
    assert h1 <= LANES and h2 < LANES, "hidden dims must fit in 128 lanes"
    # TODO(synk): output_size > 8 would need >1 sublane group in the W3 slab
    # (or the old (B, 128)-slab output path); module default is 1.
    assert out_f <= 8, "lane-packed output path supports output_size <= 8"

    # bf16 MXU operands (kernel accumulates in f32).
    w1p = jnp.zeros((in_f, LANES), jnp.float32).at[:, :h1].set(w1)
    w2p = jnp.zeros((LANES, LANES), jnp.float32).at[:h1, :h2].set(w2)

    # W3 slab: row r holds fc3 column r over the h2 feature lanes; lane `h2`
    # carries b3[r] (picked up by the constant-1 feature injected via b2).
    w3s = jnp.zeros((8, LANES), jnp.float32)
    w3s = w3s.at[:out_f, :h2].set(w3.T)
    w3s = w3s.at[:out_f, h2].set(b3[0])

    # Bias slab (f32): row 0 = b1, row 1 = b2 with the constant-1 lane.
    bias = jnp.zeros((8, LANES), jnp.float32)
    bias = bias.at[0, :h1].set(b1[0])
    bias = bias.at[1, :h2].set(b2[0])
    bias = bias.at[1, h2].set(1.0)

    return dict(
        w1=w1p.astype(jnp.bfloat16),
        w2=w2p.astype(jnp.bfloat16),
        w3=w3s.astype(jnp.bfloat16),
        bias=bias,
        input_size=in_f, output_size=out_f,
    )


# ---------------------------------------------------------------------------
# Wrapper.
# batch_tile: rows per grid step (multiple of 128 recommended).  Default 2048
# keeps VMEM use tiny on all generations while amortising per-step overhead;
# any B > 2048 yields >= 2 grid tiles so v7x's two TensorCores both get work.
# ---------------------------------------------------------------------------
def kidney_forward(x, prep, batch_tile=2048):
    B, F = x.shape
    assert F == prep["input_size"]
    out_f = prep["output_size"]

    if B <= batch_tile:
        tb = B                      # single full-extent block, no padding
    else:
        tb = batch_tile             # ragged tail handled by Pallas (no wrapper pad)
    n_tiles = pl.cdiv(B, tb)

    w1, w2, w3, bias = prep["w1"], prep["w2"], prep["w3"], prep["bias"]

    flops = 2 * B * (F * LANES + LANES * LANES + 8 * LANES)
    bytes_accessed = (x.size * x.dtype.itemsize
                      + w1.size * 2 + w2.size * 2 + w3.size * 2
                      + bias.size * 4 + 8 * B * 4)
    cost = pl.CostEstimate(flops=flops, transcendentals=8 * B,
                           bytes_accessed=bytes_accessed)

    out = pl.pallas_call(
        kidney_kernel,
        out_shape=jax.ShapeDtypeStruct((8, B), jnp.float32),
        grid=(n_tiles,),
        in_specs=[
            pl.BlockSpec((tb, F), lambda i: (i, 0)),       # x: tiled on batch
            pl.BlockSpec(w1.shape, lambda i: (0, 0)),      # weights stay resident
            pl.BlockSpec(w2.shape, lambda i: (0, 0)),
            pl.BlockSpec(w3.shape, lambda i: (0, 0)),
            pl.BlockSpec(bias.shape, lambda i: (0, 0)),
        ],
        # Lane-packed output: batch along lanes, 8 sublanes (rows >= out_f are
        # sigmoid(0)=0.5 filler, sliced away below).
        out_specs=pl.BlockSpec((8, tb), lambda i: (0, i)),
        compiler_params=pltpu.CompilerParams(
            dimension_semantics=("parallel",)),
        cost_estimate=cost,
    )(x, w1, w2, w3, bias)

    return out[:out_f, :B].T                                # (B, out_f)


# ---------------------------------------------------------------------------
# Original (unfused) parameters, mirroring KidneyDiseaseModelAF.__init__
# ---------------------------------------------------------------------------
def init_params(key, input_size=24, output_size=1):
    k1, k2, k3, k4, k5, k6 = jax.random.split(key, 6)

    def norm_params(features):
        # PyTorch init: gamma=ones, beta=zeros, m=ones, v=ones
        return (
            jnp.ones((1, features), jnp.float32),
            jnp.zeros((1, features), jnp.float32),
            jnp.ones((1, features), jnp.float32),
            jnp.ones((1, features), jnp.float32),
        )

    g0, be0, m0, v0 = norm_params(input_size)
    g1, be1, m1, v1 = norm_params(64)
    g2, be2, m2, v2 = norm_params(32)

    w1 = 0.1 * jax.random.normal(k1, (input_size, 64), jnp.float32)
    b1 = 0.1 * jax.random.normal(k2, (1, 64), jnp.float32)
    w2 = 0.1 * jax.random.normal(k3, (64, 32), jnp.float32)
    b2 = 0.1 * jax.random.normal(k4, (1, 32), jnp.float32)
    w3 = 0.1 * jax.random.normal(k5, (32, output_size), jnp.float32)
    b3 = 0.1 * jax.random.normal(k6, (1, output_size), jnp.float32)

    return dict(
        g0=g0, be0=be0, m0=m0, v0=v0, w1=w1, b1=b1,
        g1=g1, be1=be1, m1=m1, v1=v1, w2=w2, b2=b2,
        g2=g2, be2=be2, m2=m2, v2=v2, w3=w3, b3=b3,
    )


def reference_forward(x, p):
    """Pure-JAX f32 reference mirroring the PyTorch forward exactly."""
    def norm(h, g, be, m, v):
        return (h - m) / jnp.sqrt(v + EPS) * g + be

    h = norm(x, p["g0"], p["be0"], p["m0"], p["v0"])
    h = jnp.maximum(h @ p["w1"] + p["b1"], 0.0)
    h = norm(h, p["g1"], p["be1"], p["m1"], p["v1"])
    h = jnp.maximum(h @ p["w2"] + p["b2"], 0.0)
    h = norm(h, p["g2"], p["be2"], p["m2"], p["v2"])
    h = h @ p["w3"] + p["b3"]
    return jax.nn.sigmoid(h)


if __name__ == "__main__":
    key = jax.random.PRNGKey(0)
    kx, kx2, kp = jax.random.split(key, 3)

    B, INPUT_SIZE, OUTPUT_SIZE = 8, 24, 1
    x = jax.random.normal(kx, (B, INPUT_SIZE), jnp.float32)
    params = init_params(kp, INPUT_SIZE, OUTPUT_SIZE)
    prep = prepare_params(params)            # one-time fold + pack + pad + bf16

    # Small single-tile run (full-extent blocks).
    out = jax.block_until_ready(kidney_forward(x, prep))
    ref = reference_forward(x, params)
    assert out.shape == (B, OUTPUT_SIZE), out.shape
    # bf16 MXU operands -> relaxed tolerance vs the f32 reference.
    assert jnp.allclose(out, ref, atol=1e-2), (out, ref)

    # Multi-tile run: 4 grid steps, lane-dense (8, 128) output stores.
    B2 = 512
    x2 = jax.random.normal(kx2, (B2, INPUT_SIZE), jnp.float32)
    out2 = jax.block_until_ready(kidney_forward(x2, prep, batch_tile=128))
    ref2 = reference_forward(x2, params)
    assert out2.shape == (B2, OUTPUT_SIZE), out2.shape
    assert jnp.allclose(out2, ref2, atol=1e-2), jnp.max(jnp.abs(out2 - ref2))

    print("KERNEL_OK")
</pallas_src>

<mosaic_0001>
module attributes {stable_mosaic.version = 11 : i64} {
  func.func @kidney_kernel(%arg0: i32, %arg1: memref<8x24xf32, #tpu.memory_space<vmem>>, %arg2: memref<24x128xbf16, #tpu.memory_space<vmem>>, %arg3: memref<128x128xbf16, #tpu.memory_space<vmem>>, %arg4: memref<8x128xbf16, #tpu.memory_space<vmem>>, %arg5: memref<8x128xf32, #tpu.memory_space<vmem>>, %arg6: memref<8x8xf32, #tpu.memory_space<vmem>>) attributes {dimension_semantics = [#tpu.dimension_semantics<parallel>], iteration_bounds = array<i64: 1>, scalar_prefetch = 0 : i64, scratch_operands = 0 : i64, tpu.core_type = #tpu.core_type<tc>, window_params = [{transform_indices = @transform_0, window_bounds = array<i64: 8, 24>}, {pipeline_mode = #tpu.pipeline_mode<synchronous>, transform_indices = @transform_1, window_bounds = array<i64: 24, 128>}, {pipeline_mode = #tpu.pipeline_mode<synchronous>, transform_indices = @transform_2, window_bounds = array<i64: 128, 128>}, {pipeline_mode = #tpu.pipeline_mode<synchronous>, transform_indices = @transform_3, window_bounds = array<i64: 8, 128>}, {pipeline_mode = #tpu.pipeline_mode<synchronous>, transform_indices = @transform_4, window_bounds = array<i64: 8, 128>}, {transform_indices = @transform_5, window_bounds = array<i64: 8, 8>}]} {
    %c0 = arith.constant 0 : index
    %c0_0 = arith.constant 0 : index
    %0 = vector.load %arg1[%c0, %c0_0] : memref<8x24xf32, #tpu.memory_space<vmem>>, vector<8x24xf32>
    %1 = arith.truncf %0 : vector<8x24xf32> to vector<8x24xbf16>
    %c0_1 = arith.constant 0 : index
    %c0_2 = arith.constant 0 : index
    %2 = vector.load %arg5[%c0_1, %c0_2] : memref<8x128xf32, #tpu.memory_space<vmem>>, vector<1x128xf32>
    %c1 = arith.constant 1 : index
    %c0_3 = arith.constant 0 : index
    %3 = vector.load %arg5[%c1, %c0_3] : memref<8x128xf32, #tpu.memory_space<vmem>>, vector<1x128xf32>
    %c0_4 = arith.constant 0 : index
    %c0_5 = arith.constant 0 : index
    %4 = vector.load %arg2[%c0_4, %c0_5] : memref<24x128xbf16, #tpu.memory_space<vmem>>, vector<24x128xbf16>
    %cst = arith.constant dense<0.000000e+00> : vector<8x128xf32>
    %5 = tpu.matmul %1, %4, %cst {dimension_numbers = #tpu.dot_dimension_numbers<[1], [0], [0], [1], [0, 0, 1, 1], [], []>} : vector<8x24xbf16>, vector<24x128xbf16>, vector<8x128xf32> -> vector<8x128xf32>
    %6 = vector.broadcast %2 : vector<1x128xf32> to vector<8x128xf32>
    %7 = arith.addf %5, %6 : vector<8x128xf32>
    %cst_6 = arith.constant 0.000000e+00 : f32
    %8 = vector.broadcast %cst_6 : f32 to vector<8x128xf32>
    %9 = arith.maximumf %7, %8 : vector<8x128xf32>
    %10 = arith.truncf %9 : vector<8x128xf32> to vector<8x128xbf16>
    %c0_7 = arith.constant 0 : index
    %c0_8 = arith.constant 0 : index
    %11 = vector.load %arg3[%c0_7, %c0_8] : memref<128x128xbf16, #tpu.memory_space<vmem>>, vector<128x128xbf16>
    %cst_9 = arith.constant dense<0.000000e+00> : vector<8x128xf32>
    %12 = tpu.matmul %10, %11, %cst_9 {dimension_numbers = #tpu.dot_dimension_numbers<[1], [0], [0], [1], [0, 0, 1, 1], [], []>} : vector<8x128xbf16>, vector<128x128xbf16>, vector<8x128xf32> -> vector<8x128xf32>
    %13 = vector.broadcast %3 : vector<1x128xf32> to vector<8x128xf32>
    %14 = arith.addf %12, %13 : vector<8x128xf32>
    %cst_10 = arith.constant 0.000000e+00 : f32
    %15 = vector.broadcast %cst_10 : f32 to vector<8x128xf32>
    %16 = arith.maximumf %14, %15 : vector<8x128xf32>
    %17 = arith.truncf %16 : vector<8x128xf32> to vector<8x128xbf16>
    %c0_11 = arith.constant 0 : index
    %c0_12 = arith.constant 0 : index
    %18 = vector.load %arg4[%c0_11, %c0_12] : memref<8x128xbf16, #tpu.memory_space<vmem>>, vector<8x128xbf16>
    %cst_13 = arith.constant dense<0.000000e+00> : vector<8x8xf32>
    %19 = tpu.matmul %18, %17, %cst_13 {dimension_numbers = #tpu.dot_dimension_numbers<[1], [1], [0], [0], [0, 0, 1, 0], [], []>} : vector<8x128xbf16>, vector<8x128xbf16>, vector<8x8xf32> -> vector<8x8xf32>
    %20 = arith.negf %19 : vector<8x8xf32>
    %21 = math.exp %20 : vector<8x8xf32>
    %cst_14 = arith.constant 1.000000e+00 : f32
    %22 = vector.broadcast %cst_14 : f32 to vector<8x8xf32>
    %23 = arith.addf %22, %21 : vector<8x8xf32>
    %24 = arith.divf %22, %23 : vector<8x8xf32>
    %c0_15 = arith.constant 0 : index
    %c0_16 = arith.constant 0 : index
    %25 = vector.load %arg6[%c0_15, %c0_16] : memref<8x8xf32, #tpu.memory_space<vmem>>, vector<8x8xf32>
    tpu.vector_store %arg6[%c0_15, %c0_16], %24 {strides = array<i32>} : memref<8x8xf32, #tpu.memory_space<vmem>>, vector<8x8xf32>,
    return
  }
  func.func @transform_0(%arg0: i32) -> (i32, i32) {
    %c0_i32 = arith.constant 0 : i32
    %c0_i32_0 = arith.constant 0 : i32
    return %arg0, %c0_i32 : i32, i32
  }
  func.func @transform_1(%arg0: i32) -> (i32, i32) {
    %c0_i32 = arith.constant 0 : i32
    %c0_i32_0 = arith.constant 0 : i32
    %c0_i32_1 = arith.constant 0 : i32
    return %c0_i32, %c0_i32_0 : i32, i32
  }
  func.func @transform_2(%arg0: i32) -> (i32, i32) {
    %c0_i32 = arith.constant 0 : i32
    %c0_i32_0 = arith.constant 0 : i32
    %c0_i32_1 = arith.constant 0 : i32
    return %c0_i32, %c0_i32_0 : i32, i32
  }
  func.func @transform_3(%arg0: i32) -> (i32, i32) {
    %c0_i32 = arith.constant 0 : i32
    %c0_i32_0 = arith.constant 0 : i32
    %c0_i32_1 = arith.constant 0 : i32
    return %c0_i32, %c0_i32_0 : i32, i32
  }
  func.func @transform_4(%arg0: i32) -> (i32, i32) {
    %c0_i32 = arith.constant 0 : i32
    %c0_i32_0 = arith.constant 0 : i32
    %c0_i32_1 = arith.constant 0 : i32
    return %c0_i32, %c0_i32_0 : i32, i32
  }
  func.func @transform_5(%arg0: i32) -> (i32, i32) {
    %c0_i32 = arith.constant 0 : i32
    %c0_i32_0 = arith.constant 0 : i32
    return %c0_i32, %arg0 : i32, i32
  }
}

</mosaic_0001>

<bundles_post_ra>
// kernel: tpu_custom_call.1
= control target key start
LH: loop header
LB: loop body
LE: loop exit
PB: predicated region body
PF: predicated region fallthrough
CT: control target
= control target key end

     0   :  { %10 = vsyncpa [#allocation3], 0  ;;  %s537_s0 = inlined_call_operand.hbm [shape: f32[8,24], index: 0, kind: input, shape index: {}]   ;;  %s538_s1 = inlined_call_operand.hbm [shape: bf16[24,128], index: 1, kind: input, shape index: {}]   ;;  %s539_s2 = inlined_call_operand.hbm [shape: bf16[128,128], index: 2, kind: input, shape index: {}]   ;;  %s540_s3 = inlined_call_operand.hbm [shape: bf16[8,128], index: 3, kind: input, shape index: {}]   ;;  %s541_s4 = inlined_call_operand.hbm [shape: f32[8,128], index: 4, kind: input, shape index: {}]   ;;  %s542_s5 = inlined_call_operand.hbm [shape: f32[8,8], index: 5, kind: output, shape index: {}]  }
   0x1   :  { %11 = vsyncpa [#allocation6], 0 }
   0x2   :  { %12 = vsyncpa [#allocation9], 0  ;;  %s29_s20 = sshll.u32 %s538_s1, 4  ;;  %s30_s20 = int_to_ptr.hbm [resolvable:$true] %s29_s20 }
   0x3   :  { %13 = vsyncpa [#allocation4], 0  ;;  %s481_s21 = smov [#allocation5]   ;;  %s56_s25 = sshll.u32 %s540_s3, 4  ;;  %s57_s25 = int_to_ptr.hbm [resolvable:$true] %s56_s25 }
   0x4   :  { %s31_s22 = sshll.u32 %s481_s21, 4  ;;  %s482_s26 = smov 64   ;;  %s32_s22 = int_to_ptr.vmem [resolvable:$true] %s31_s22 }
   0x5   :  { %s483_s27 = smov 4   ;;  %s484_s28 = smov [#allocation8]  }
   0x6   :  { %37 = dma.hbm_to_vmem [thread:$0]  %s30_s20, 192, %s32_s22, [#allocation6], %s482_s26, %s482_s26, %s483_s27  }
   0x7   :  { %s58_s29 = sshll.u32 %s484_s28, 4  ;;  %s19_s7 = sshll.u32 %s537_s0, 4  ;;  %s59_s29 = int_to_ptr.vmem [resolvable:$true] %s58_s29  ;;  %s20_s7 = int_to_ptr.hbm [resolvable:$true] %s19_s7 }
   0x8   :  { %61 = dma.hbm_to_vmem [thread:$0]  %s57_s25, 64, %s59_s29, [#allocation9]  }
   0x9   :  { %s42_s9 = sshll.u32 %s539_s2, 4  ;;  %s485_s10 = smov [#allocation2]   ;;  %s43_s9 = int_to_ptr.hbm [resolvable:$true] %s42_s9 }
   0xa   :  { %s21_s11 = sshll.u32 %s485_s10, 4  ;;  %s486_s3 = smov [#allocation7]   ;;  %s22_s11 = int_to_ptr.vmem [resolvable:$true] %s21_s11 }
   0xb   :  { %24 = dma.hbm_to_vmem [thread:$0]  %s20_s7, 128, %s22_s11, [#allocation3]  }
   0xc   :  { %s44_s12 = sshll.u32 %s486_s3, 4  ;;  %s67_s15 = sshll.u32 %s541_s4, 4  ;;  %s45_s12 = int_to_ptr.vmem [resolvable:$true] %s44_s12  ;;  %s68_s15 = int_to_ptr.hbm [resolvable:$true] %s67_s15 }
   0xd   :  { %50 = dma.hbm_to_vmem [thread:$0]  %s43_s9, 1024, %s45_s12, [#allocation6], %s482_s26, %s482_s26, %s483_s27  }
   0xe   :  { %s487_s0 = smov [#allocation10]  }
   0xf   :  { %s69_s16 = sshll.u32 %s487_s0, 4  ;;  %s70_s16 = int_to_ptr.vmem [resolvable:$true] %s69_s16 }
  0x10   :  { %72 = dma.hbm_to_vmem [thread:$0]  %s68_s15, 128, %s70_s16, [#allocation9]  }
  0x11   :  { %473 = dma.done.wait [#allocation3], 128  }
  0x12   :  { %474 = vsyncadd [#allocation3], 4294967168 }
  0x13   :  { %475 = dma.done.wait [#allocation6], 1216  }
  0x14   :  { %476 = vsyncadd [#allocation6], 4294966080 }
  0x15   :  { %477 = dma.done.wait [#allocation9], 192  }
  0x16   :  { %478 = vsyncadd [#allocation9], 4294967104  ;;  %v100_v0 = vld [vmem:[#allocation5 + $0x8] sm:$0xf]  ;;  %vm115_vm0 = vcmask 1043456   ;;  %v313_v4 = vld [vmem:[#allocation7 + $0x30] sm:$0xff] }
  0x17   :  { %v107_v1 = vunpack.c.l.b16 %v100_v0  ;;  %v314_v2 = vld [vmem:[#allocation7 + $0x38] sm:$0xff]  ;;  %v94_v7 = vld [vmem:[#allocation2] sm:$0xff]  ;;  %vm111_vm1 = vcmask 195584   ;;  %v311_v10 = vld [vmem:[#allocation7 + $0x20] sm:$0xff]  ;;  %s488_s2 = smov [#allocation11]   ;;  %s256_s19 = sshll.u32 %s542_s5, 4  ;;  %s257_s19 = int_to_ptr.hbm [resolvable:$true] %s256_s19 }
  0x18   :  { %199 = vmatpush.bf16.msra.mxu1 %v314_v2  ;;  %v306_v6 = vld [vmem:[#allocation5] sm:$0xff]  ;;  %v312_v8 = vld [vmem:[#allocation7 + $0x28] sm:$0xff]  ;;  %v95_v9 = vpack.c.bf16 %v94_v7, %v94_v7  ;;  %v307_v14 = vld [vmem:[#allocation7] sm:$0xff]  ;;  %s254_s4 = sshll.u32 %s488_s2, 4  ;;  %vm247_vm5 = vcmask 64512   ;;  %s255_s4 = int_to_ptr.vmem [resolvable:$true] %s254_s4 }
  0x19   :  { %v109_v3 = vpack.c.b16 %v107_v1, %v107_v1  ;;  %v310_v11 = vld [vmem:[#allocation7 + $0x18] sm:$0xff]  ;;  %v309_v12 = vld [vmem:[#allocation7 + $0x10] sm:$0xff]  ;;  %v308_v13 = vld [vmem:[#allocation7 + $0x8] sm:$0xff] }
  0x1a   :  { %v323_v15 = vld [vmem:[#allocation10] ss:$0 sm:$0xff]  ;;  %v324_v21 = vld [vmem:[#allocation10 + $0x1] ss:$0 sm:$0xff]  ;;  %v214_v27 = vld [vmem:[#allocation8] sm:$0xf] }
  0x1b   :  { %v117_v5 = vsel %vm115_vm0, %v109_v3, 0 }
  0x1c   :  { %125 = vmatpush.bf16.msra.mxu0 %v117_v5  ;;  %200 = vmatpush.bf16.msra.mxu1 %v313_v4 }
  0x20   :  { %126 = vmatpush.bf16.msra.mxu0 %v306_v6  ;;  %201 = vmatpush.bf16.msra.mxu1 %v312_v8 }
  0x23   :  { %272 = vmatmul.msk.bf16.vlgmr.msra.gmra.mxu0 %vm111_vm1, %v95_v9 }
  0x24   :  { %202 = vmatpush.bf16.msra.mxu1 %v311_v10 }
  0x28   :  { %203 = vmatpush.bf16.msra.mxu1 %v310_v11 }
  0x2c   :  { %204 = vmatpush.bf16.msra.mxu1 %v309_v12 }
  0x30   :  { %205 = vmatpush.bf16.msra.mxu1 %v308_v13 }
  0x34   :  { %206 = vmatpush.bf16.msra.mxu1 %v307_v14 }
  0xa0   :  { %v128_v16 = vpop.f32.mrf.mxu0 }
  0xa1   :  { %v129_v17 = vadd.f32 %v323_v15, %v128_v16 }
  0xa3   :  { %v132_v18 = vmax.f32 %v129_v17, 0.0 }
  0xa5   :  { %v133_v19 = vpack.c.bf16 %v132_v18, %v132_v18 }
  0xa7   :  { %207 = vmatmul.bf16.vlgmr.msra.gmra.mxu1 %v133_v19 }
  0xa8   :  { %v130_v20 = vpop.f32.mrf.mxu0 }
 0x124   :  { %v208_v22 = vpop.f32.mrf.mxu1 }
 0x125   :  { %v209_v23 = vadd.f32 %v324_v21, %v208_v22 }
 0x127   :  { %v212_v24 = vmax.f32 %v209_v23, 0.0 }
 0x129   :  { %v213_v25 = vpack.c.bf16 %v212_v24, %v212_v24 }
 0x12b   :  { %222 = vmatpush.bf16.xpose.msra.mxu2 %v213_v25 }
 0x12c   :  { %v210_v26 = vpop.f32.mrf.mxu1 }
 0x132   :  { %223 = vmatmul.bf16.vlgmr.msra.gmra.mxu2 %v214_v27 }
 0x1b5   :  { %v224_v28 = vpop.f32.mrf.mxu2 }
 0x1b6   :  { %v305_v29 = vmul.f32 -1.442695, %v224_v28 }
 0x1b8   :  { %325 = vpow2.f32 %v305_v29 }
 0x1bd   :  { %v226_v30 = vpop.f32.mrf.mxu2 }
 0x1be   :  { %v326_v31 = vpop.eup %325 }
 0x1bf   :  { %v231_v32 = vadd.f32 1.0, %v326_v31 }
 0x1c1   :  { %327 = vrcp.f32 %v231_v32  ;;  %v243_v36 = vand.u32 2147483648, %v231_v32  ;;  %v241_v38 = vand.u32 2147483647, %v231_v32  ;;  %vm237_vm3 = vweird.f32 %v231_v32 }
 0x1c3   :  { %v244_v40 = vor.u32 1.1754944e-38, %v243_v36  ;;  %vm242_vm6 = vcmp.eq.f32.partialorder %v241_v38, 8.507059e+37 }
 0x1c7   :  { %v328_v33 = vpop.eup %327 }
 0x1c8   :  { %v233_v34 = vmul.f32 %v328_v33, %v231_v32  ;;  %vm238_vm2 = vweird.f32 %v328_v33 }
 0x1c9   :  { %vm239_vm4 = vmor %vm237_vm3, %vm238_vm2 }
 0x1ca   :  { %v234_v35 = vsub.f32 1.0, %v233_v34 }
 0x1cc   :  { %v235_v37 = vmul.f32 %v328_v33, %v234_v35 }
 0x1ce   :  { %v236_v39 = vadd.f32 %v328_v33, %v235_v37 }
 0x1d0   :  { %v240_v41 = vsel %vm239_vm4, %v328_v33, %v236_v39 }
 0x1d1   :  { %v245_v42 = vsel %vm242_vm6, %v244_v40, %v240_v41 }
 0x1d2   :  { %248 = vst.msk [vmem:[#allocation11] sm:$0xff] %vm247_vm5, %v245_v42 }
 0x1d3   :  { %259 = dma.vmem_to_hbm [thread:$0]  %s255_s4, 128, %s257_s19, [#allocation4]  }
 0x1d4   :  { %479 = dma.done.wait [#allocation4], 128  }
 0x1d5   :  { %480 = vsyncadd [#allocation4], 4294967168 }
 0x1d6   :  { %264 = vsyncpa [#allocation3], 1 }
 0x1d7   :  { %265 = vsyncpa [#allocation6], 1 }
 0x1d8   :  { %266 = vsyncpa [#allocation9], 1 }
 0x1d9   :  { %267 = vsyncpa [#allocation4], 1 }

</bundles_post_ra>
